<compile_context>
chip_gen: v7x
topology: tpu7x:2x2x1
jax: 0.10.0
libtpu: 0.0.40
codegen_flags: <defaults>
</compile_context>

<pallas_src>
import functools

import jax
import jax.numpy as jnp
from jax import lax
from jax.experimental import pallas as pl
from jax.experimental.pallas import tpu as pltpu


# ---------------------------------------------------------------------------
# Kernel 1: fused Q/K/V projection (1x1 convs == channel matmuls)
# ---------------------------------------------------------------------------
def _pam_qkv_kernel(x_ref, w_ref, b_ref, q_ref, k_ref, v_ref):
    # x_ref : (1, C, TN) f32   w_ref : (CO, C) bf16   b_ref : (CO, 1) f32
    # q_ref : (1, C8, TN) bf16 k_ref : (1, C8, TN) bf16 v_ref : (1, C, TN) bf16
    c8 = q_ref.shape[1]
    x = x_ref[0].astype(jnp.bfloat16)                              # (C, TN)
    # One lane-dense MXU matmul (fp32 accumulation) + fp32 per-channel bias.
    qkv = jnp.dot(w_ref[...], x, preferred_element_type=jnp.float32)
    qkv = qkv + b_ref[...]                                         # (CO, TN)
    # Sublane slices at multiples of 8; lane dim stays full (no masked stores).
    q_ref[0, :, :] = qkv[:c8, :].astype(q_ref.dtype)
    k_ref[0, :, :] = qkv[c8:2 * c8, :].astype(k_ref.dtype)
    v_ref[0, :, :] = qkv[2 * c8:, :].astype(v_ref.dtype)


# ---------------------------------------------------------------------------
# Kernel 2: flash-style position attention + gamma * out + x residual
# ---------------------------------------------------------------------------
def _pam_attn_kernel(q_ref, k_ref, v_ref, x_ref, gamma_ref, o_ref,
                     m_sc, l_sc, acc_sc, *, n_valid, tk):
    # q_ref : (1, C8, TQ) bf16   k_ref : (1, C8, TK) bf16  v_ref : (1, C, TK) bf16
    # x_ref : (1, C, TQ) f32     gamma_ref : (1,) f32 SMEM  o_ref : (1, C, TQ) f32
    # m_sc / l_sc : (1, TQ) f32  acc_sc : (C, TQ) f32
    ki = pl.program_id(2)

    @pl.when(ki == 0)
    def _init():
        m_sc[...] = jnp.full_like(m_sc, -jnp.inf)
        l_sc[...] = jnp.zeros_like(l_sc)
        acc_sc[...] = jnp.zeros_like(acc_sc)

    q = q_ref[0]                                                   # (C8, TQ)
    k = k_ref[0]                                                   # (C8, TK)
    # s[j, i] = <k_j, q_i> = energy[i, j]; contract the shared C8 dim.
    s = lax.dot_general(k, q, dimension_numbers=(((0,), (0,)), ((), ())),
                        preferred_element_type=jnp.float32)        # (TK, TQ)

    if n_valid is not None:
        # Mask padded key positions (>= H*W) out of the softmax.
        key_idx = ki * tk + lax.broadcasted_iota(jnp.int32, (s.shape[0], 1), 0)
        s = jnp.where(key_idx < n_valid, s, -jnp.inf)

    # Online softmax over keys (axis 0); all statistics in fp32.
    m_prev = m_sc[...]                                             # (1, TQ)
    m_new = jnp.maximum(m_prev, jnp.max(s, axis=0, keepdims=True))
    alpha = jnp.exp(m_prev - m_new)                                # (1, TQ)
    p = jnp.exp(s - m_new)                                         # (TK, TQ)
    l_sc[...] = alpha * l_sc[...] + jnp.sum(p, axis=0, keepdims=True)
    # PV: (C, TK) @ (TK, TQ) -> (C, TQ); bf16 operands, fp32 accumulation.
    pv = jnp.dot(v_ref[0], p.astype(v_ref.dtype),
                 preferred_element_type=jnp.float32)
    acc_sc[...] = alpha * acc_sc[...] + pv
    m_sc[...] = m_new

    @pl.when(ki == pl.num_programs(2) - 1)
    def _finalize():
        inv_l = pl.reciprocal(l_sc[...], approx=True)              # EUP slot
        gamma = gamma_ref[0]                                       # SMEM scalar
        o_ref[0, :, :] = (gamma * (acc_sc[...] * inv_l)
                          + x_ref[0]).astype(o_ref.dtype)


# ---------------------------------------------------------------------------
# Wrapper helpers
# ---------------------------------------------------------------------------
def _round_up(n, m):
    return ((n + m - 1) // m) * m


def _pick_tile(n, target=512):
    """Largest divisor of n <= target, preferring multiples of 256, then 128."""
    if n <= target:
        return n
    for step in (256, 128, 8):
        t = (target // step) * step
        while t >= step:
            if n % t == 0:
                return t
            t -= step
    return n


def _vmem_limit(logical_bytes):
    # Actual double-buffered footprint + headroom, capped at 48 MiB so v7x's
    # 64 MiB physical VMEM keeps room for compiler-internal scratch.
    return int(min(48 << 20, max(logical_bytes + (8 << 20), 16 << 20)))


def pam_module_forward(x_nchw, wq, bq, wk, bk, wv, bv, gamma):
    """PAM_Module forward.  x_nchw: (B, C, H, W) f32 -> (B, C, H, W) f32."""
    B, C, H, W = x_nchw.shape
    C8 = wq.shape[0]
    assert C % 8 == 0, "in_dim must be a multiple of 8 for TPU sublane tiling"
    N = H * W
    CO = 2 * C8 + C

    # Keep PyTorch's (B, C, H*W) flattening; pad spatial positions to a
    # multiple of 128 (padded key columns are -inf masked in the kernel).
    Np = N if N % 128 == 0 else _round_up(N, 128)
    x_flat = x_nchw.reshape(B, C, N).astype(jnp.float32)
    if Np != N:
        x_flat = jnp.pad(x_flat, ((0, 0), (0, 0), (0, Np - N)))

    # Fused projection params: weights (C_out, C_in) pre-cast to bf16 on host.
    w_cat = jnp.concatenate([wq, wk, wv], axis=0).astype(jnp.bfloat16)
    b_cat = jnp.concatenate([bq, bk, bv]).reshape(CO, 1).astype(jnp.float32)

    # --- Kernel 1: fused QKV projection -------------------------------------
    TR = _pick_tile(Np)
    while B * (Np // TR) < 2 and TR >= 256 and TR % 256 == 0:   # v7x: 2 TCs
        TR //= 2

    qkv_bytes = 2 * (C * TR * 4            # x tile (double-buffered)
                     + CO * C * 2          # fused weight
                     + CO * 128 * 4        # bias (lane-padded)
                     + 2 * C8 * TR * 2     # q + k outputs
                     + C * TR * 2)         # v output
    q, k, v = pl.pallas_call(
        _pam_qkv_kernel,
        out_shape=(
            jax.ShapeDtypeStruct((B, C8, Np), jnp.bfloat16),
            jax.ShapeDtypeStruct((B, C8, Np), jnp.bfloat16),
            jax.ShapeDtypeStruct((B, C, Np), jnp.bfloat16),
        ),
        grid_spec=pltpu.PrefetchScalarGridSpec(
            num_scalar_prefetch=0,
            grid=(B, Np // TR),
            in_specs=[
                pl.BlockSpec((1, C, TR), lambda b, r: (b, 0, r)),    # x
                pl.BlockSpec((CO, C), lambda b, r: (0, 0)),          # w_cat
                pl.BlockSpec((CO, 1), lambda b, r: (0, 0)),          # b_cat
            ],
            out_specs=[
                pl.BlockSpec((1, C8, TR), lambda b, r: (b, 0, r)),   # q
                pl.BlockSpec((1, C8, TR), lambda b, r: (b, 0, r)),   # k
                pl.BlockSpec((1, C, TR), lambda b, r: (b, 0, r)),    # v
            ],
        ),
        compiler_params=pltpu.CompilerParams(
            dimension_semantics=("parallel", "parallel"),
            vmem_limit_bytes=_vmem_limit(qkv_bytes)),
    )(x_flat, w_cat, b_cat)

    # --- Kernel 2: flash attention + gamma * out + residual -----------------
    TQ = _pick_tile(Np)
    TK = _pick_tile(Np)
    while B * (Np // TQ) < 2 and TQ >= 256 and TQ % 256 == 0:   # v7x: 2 TCs
        TQ //= 2

    attn_bytes = (2 * (C8 * TQ * 2         # q tile
                       + C8 * TK * 2       # k tile
                       + C * TK * 2        # v tile
                       + C * TQ * 4        # x residual tile
                       + C * TQ * 4)       # output tile
                  + C * TQ * 4             # fp32 accumulator
                  + 2 * 8 * TQ * 4)        # m / l (sublane-padded)
    gamma_smem = gamma.reshape(1).astype(jnp.float32)
    attn_kernel = functools.partial(_pam_attn_kernel,
                                    n_valid=None if Np == N else N, tk=TK)

    out_flat = pl.pallas_call(
        attn_kernel,
        out_shape=jax.ShapeDtypeStruct((B, C, Np), jnp.float32),
        grid_spec=pltpu.PrefetchScalarGridSpec(
            num_scalar_prefetch=0,
            grid=(B, Np // TQ, Np // TK),
            in_specs=[
                pl.BlockSpec((1, C8, TQ), lambda b, qi, ki: (b, 0, qi)),  # q
                pl.BlockSpec((1, C8, TK), lambda b, qi, ki: (b, 0, ki)),  # k
                pl.BlockSpec((1, C, TK), lambda b, qi, ki: (b, 0, ki)),   # v
                pl.BlockSpec((1, C, TQ), lambda b, qi, ki: (b, 0, qi)),   # x
                pl.BlockSpec(memory_space=pltpu.MemorySpace.SMEM),        # gamma
            ],
            out_specs=pl.BlockSpec((1, C, TQ), lambda b, qi, ki: (b, 0, qi)),
            scratch_shapes=[
                pltpu.VMEM((1, TQ), jnp.float32),   # running max m
                pltpu.VMEM((1, TQ), jnp.float32),   # running sum l
                pltpu.VMEM((C, TQ), jnp.float32),   # fp32 output accumulator
            ],
        ),
        compiler_params=pltpu.CompilerParams(
            dimension_semantics=("parallel", "parallel", "arbitrary"),
            vmem_limit_bytes=_vmem_limit(attn_bytes)),
    )(q, k, v, x_flat, gamma_smem)

    # (B, C, Np) -> (B, C, H, W); no transpose needed in this layout.
    return out_flat[:, :, :N].reshape(B, C, H, W)


# ---------------------------------------------------------------------------
# Pure-JAX fp32 reference mirroring the PyTorch forward
# ---------------------------------------------------------------------------
def _reference(x_nchw, wq, bq, wk, bk, wv, bv, gamma):
    B, C, H, W = x_nchw.shape
    N = H * W
    x_flat = x_nchw.reshape(B, C, N)                               # (B, C, N)
    q = jnp.einsum('oc,bcn->bon', wq, x_flat) + bq[None, :, None]  # (B, C8, N)
    k = jnp.einsum('oc,bcn->bon', wk, x_flat) + bk[None, :, None]  # (B, C8, N)
    v = jnp.einsum('oc,bcn->bon', wv, x_flat) + bv[None, :, None]  # (B, C, N)
    energy = jnp.einsum('bci,bcj->bij', q, k)                      # (B, N, N)
    attention = jax.nn.softmax(energy, axis=-1)
    out = jnp.einsum('bcj,bij->bci', v, attention)                 # (B, C, N)
    out = out.reshape(B, C, H, W)
    return gamma[0] * out + x_nchw


if __name__ == "__main__":
    # Small but TPU-friendly shapes: N = 1024 -> two 512-wide key tiles, so
    # the online-softmax accumulation across ki steps is actually exercised.
    B, C, H, W = 2, 64, 32, 32
    C8 = C // 8

    key = jax.random.PRNGKey(0)
    k_x, k_wq, k_bq, k_wk, k_bk, k_wv, k_bv = jax.random.split(key, 7)

    x = jax.random.normal(k_x, (B, C, H, W), dtype=jnp.float32)

    # Conv2d(in, out, kernel_size=1) weights: (out, in, 1, 1) -> stored (out, in).
    wq = jax.random.normal(k_wq, (C8, C), dtype=jnp.float32) * 0.05
    bq = jax.random.normal(k_bq, (C8,), dtype=jnp.float32) * 0.1
    wk = jax.random.normal(k_wk, (C8, C), dtype=jnp.float32) * 0.05
    bk = jax.random.normal(k_bk, (C8,), dtype=jnp.float32) * 0.1
    wv = jax.random.normal(k_wv, (C, C), dtype=jnp.float32) * 0.05
    bv = jax.random.normal(k_bv, (C,), dtype=jnp.float32) * 0.1
    # Module inits gamma to 0 (output == x); use a nonzero value so the
    # attention path is actually exercised.
    gamma = jnp.array([0.5], dtype=jnp.float32)

    out = pam_module_forward(x, wq, bq, wk, bk, wv, bv, gamma)
    out = jax.block_until_ready(out)

    ref = _reference(x, wq, bq, wk, bk, wv, bv, gamma)
    assert out.shape == (B, C, H, W)
    # bf16 MXU operands (fp32 accumulation) => loosen tolerance vs fp32 ref.
    max_err = float(jnp.max(jnp.abs(out - ref)))
    assert jnp.allclose(out, ref, atol=2e-2, rtol=2e-2), (
        f"mismatch vs reference, max abs err = {max_err}")

    print("KERNEL_OK")
</pallas_src>

<mosaic_0001>
module attributes {stable_mosaic.version = 11 : i64} {
  func.func @_pam_qkv_kernel(%arg0: i32, %arg1: i32, %arg2: memref<1x64x512xf32, #tpu.memory_space<vmem>>, %arg3: memref<80x64xbf16, #tpu.memory_space<vmem>>, %arg4: memref<80x1xf32, #tpu.memory_space<vmem>>, %arg5: memref<1x8x512xbf16, #tpu.memory_space<vmem>>, %arg6: memref<1x8x512xbf16, #tpu.memory_space<vmem>>, %arg7: memref<1x64x512xbf16, #tpu.memory_space<vmem>>) attributes {dimension_semantics = [#tpu.dimension_semantics<parallel>, #tpu.dimension_semantics<parallel>], iteration_bounds = array<i64: 2, 2>, scalar_prefetch = 0 : i64, scratch_operands = 0 : i64, tpu.core_type = #tpu.core_type<tc>, window_params = [{transform_indices = @transform_0, window_bounds = array<i64: 1, 64, 512>}, {pipeline_mode = #tpu.pipeline_mode<synchronous>, transform_indices = @transform_1, window_bounds = array<i64: 80, 64>}, {pipeline_mode = #tpu.pipeline_mode<synchronous>, transform_indices = @transform_2, window_bounds = array<i64: 80, 1>}, {transform_indices = @transform_3, window_bounds = array<i64: 1, 8, 512>}, {transform_indices = @transform_4, window_bounds = array<i64: 1, 8, 512>}, {transform_indices = @transform_5, window_bounds = array<i64: 1, 64, 512>}]} {
    %c0 = arith.constant 0 : index
    %c0_0 = arith.constant 0 : index
    %c0_1 = arith.constant 0 : index
    %0 = vector.load %arg2[%c0, %c0_0, %c0_1] : memref<1x64x512xf32, #tpu.memory_space<vmem>>, vector<1x64x512xf32>
    %1 = vector.shape_cast %0 : vector<1x64x512xf32> to vector<64x512xf32>
    %2 = arith.truncf %1 : vector<64x512xf32> to vector<64x512xbf16>
    %c0_2 = arith.constant 0 : index
    %c0_3 = arith.constant 0 : index
    %3 = vector.load %arg3[%c0_2, %c0_3] : memref<80x64xbf16, #tpu.memory_space<vmem>>, vector<80x64xbf16>
    %cst = arith.constant dense<0.000000e+00> : vector<80x512xf32>
    %4 = tpu.matmul %3, %2, %cst {dimension_numbers = #tpu.dot_dimension_numbers<[1], [0], [0], [1], [0, 0, 1, 1], [], []>} : vector<80x64xbf16>, vector<64x512xbf16>, vector<80x512xf32> -> vector<80x512xf32>
    %c0_4 = arith.constant 0 : index
    %c0_5 = arith.constant 0 : index
    %5 = vector.load %arg4[%c0_4, %c0_5] : memref<80x1xf32, #tpu.memory_space<vmem>>, vector<80x1xf32>
    %6 = vector.broadcast %5 : vector<80x1xf32> to vector<80x512xf32>
    %7 = arith.addf %4, %6 : vector<80x512xf32>
    %8 = vector.extract_strided_slice %7 {offsets = [0, 0], sizes = [8, 512], strides = [1, 1]} : vector<80x512xf32> to vector<8x512xf32>
    %9 = arith.truncf %8 : vector<8x512xf32> to vector<8x512xbf16>
    %c0_6 = arith.constant 0 : index
    %c0_7 = arith.constant 0 : index
    %c0_8 = arith.constant 0 : index
    %10 = vector.load %arg5[%c0_6, %c0_7, %c0_8] : memref<1x8x512xbf16, #tpu.memory_space<vmem>>, vector<1x8x512xbf16>
    %11 = vector.shape_cast %10 : vector<1x8x512xbf16> to vector<8x512xbf16>
    %12 = vector.shape_cast %9 : vector<8x512xbf16> to vector<1x8x512xbf16>
    tpu.vector_store %arg5[%c0_6, %c0_7, %c0_8], %12 {strides = array<i32>} : memref<1x8x512xbf16, #tpu.memory_space<vmem>>, vector<1x8x512xbf16>,
    %13 = vector.extract_strided_slice %7 {offsets = [8, 0], sizes = [8, 512], strides = [1, 1]} : vector<80x512xf32> to vector<8x512xf32>
    %14 = arith.truncf %13 : vector<8x512xf32> to vector<8x512xbf16>
    %c0_9 = arith.constant 0 : index
    %c0_10 = arith.constant 0 : index
    %c0_11 = arith.constant 0 : index
    %15 = vector.load %arg6[%c0_9, %c0_10, %c0_11] : memref<1x8x512xbf16, #tpu.memory_space<vmem>>, vector<1x8x512xbf16>
    %16 = vector.shape_cast %15 : vector<1x8x512xbf16> to vector<8x512xbf16>
    %17 = vector.shape_cast %14 : vector<8x512xbf16> to vector<1x8x512xbf16>
    tpu.vector_store %arg6[%c0_9, %c0_10, %c0_11], %17 {strides = array<i32>} : memref<1x8x512xbf16, #tpu.memory_space<vmem>>, vector<1x8x512xbf16>,
    %18 = vector.extract_strided_slice %7 {offsets = [16, 0], sizes = [64, 512], strides = [1, 1]} : vector<80x512xf32> to vector<64x512xf32>
    %19 = arith.truncf %18 : vector<64x512xf32> to vector<64x512xbf16>
    %c0_12 = arith.constant 0 : index
    %c0_13 = arith.constant 0 : index
    %c0_14 = arith.constant 0 : index
    %20 = vector.load %arg7[%c0_12, %c0_13, %c0_14] : memref<1x64x512xbf16, #tpu.memory_space<vmem>>, vector<1x64x512xbf16>
    %21 = vector.shape_cast %20 : vector<1x64x512xbf16> to vector<64x512xbf16>
    %22 = vector.shape_cast %19 : vector<64x512xbf16> to vector<1x64x512xbf16>
    tpu.vector_store %arg7[%c0_12, %c0_13, %c0_14], %22 {strides = array<i32>} : memref<1x64x512xbf16, #tpu.memory_space<vmem>>, vector<1x64x512xbf16>,
    return
  }
  func.func @transform_0(%arg0: i32, %arg1: i32) -> (i32, i32, i32) {
    %c0_i32 = arith.constant 0 : i32
    %c0_i32_0 = arith.constant 0 : i32
    return %arg0, %c0_i32, %arg1 : i32, i32, i32
  }
  func.func @transform_1(%arg0: i32, %arg1: i32) -> (i32, i32) {
    %c0_i32 = arith.constant 0 : i32
    %c0_i32_0 = arith.constant 0 : i32
    %c0_i32_1 = arith.constant 0 : i32
    return %c0_i32, %c0_i32_0 : i32, i32
  }
  func.func @transform_2(%arg0: i32, %arg1: i32) -> (i32, i32) {
    %c0_i32 = arith.constant 0 : i32
    %c0_i32_0 = arith.constant 0 : i32
    %c0_i32_1 = arith.constant 0 : i32
    return %c0_i32, %c0_i32_0 : i32, i32
  }
  func.func @transform_3(%arg0: i32, %arg1: i32) -> (i32, i32, i32) {
    %c0_i32 = arith.constant 0 : i32
    %c0_i32_0 = arith.constant 0 : i32
    return %arg0, %c0_i32, %arg1 : i32, i32, i32
  }
  func.func @transform_4(%arg0: i32, %arg1: i32) -> (i32, i32, i32) {
    %c0_i32 = arith.constant 0 : i32
    %c0_i32_0 = arith.constant 0 : i32
    return %arg0, %c0_i32, %arg1 : i32, i32, i32
  }
  func.func @transform_5(%arg0: i32, %arg1: i32) -> (i32, i32, i32) {
    %c0_i32 = arith.constant 0 : i32
    %c0_i32_0 = arith.constant 0 : i32
    return %arg0, %c0_i32, %arg1 : i32, i32, i32
  }
}

</mosaic_0001>

<bundles_post_ra>
// kernel: tpu_custom_call.1
= control target key start
LH: loop header
LB: loop body
LE: loop exit
PB: predicated region body
PF: predicated region fallthrough
CT: control target
= control target key end

     0   :  { %s1806_s0 = inlined_call_operand.hbm [shape: f32[2,64,1024], index: 0, kind: input, shape index: {}]   ;;  %s1807_s1 = inlined_call_operand.vmem [shape: bf16[80,64], index: 1, kind: input, shape index: {}]   ;;  %s1808_s2 = inlined_call_operand.vmem [shape: f32[80,1], index: 2, kind: input, shape index: {}]   ;;  %s1809_s3 = inlined_call_operand.hbm [shape: bf16[2,8,1024], index: 3, kind: output, shape index: {0}]   ;;  %s1810_s4 = inlined_call_operand.hbm [shape: bf16[2,8,1024], index: 4, kind: output, shape index: {1}]   ;;  %s1811_s5 = inlined_call_operand.hbm [shape: bf16[2,64,1024], index: 5, kind: output, shape index: {2}]  }
   0x1   :  { %1818 = sst [smem:[#allocation15_spill]] %s1806_s0 }
   0x2   :  { %11 = vsyncpa [#allocation3], 0 }
   0x3   :  { %13 = vsyncpa [#allocation3 + $0x1], 0 }
   0x4   :  { %14 = vsyncpa [#allocation4], 0 }
   0x5   :  { %16 = vsyncpa [#allocation4 + $0x1], 0 }
   0x6   :  { %17 = vsyncpa [#allocation7], 0 }
   0x7   :  { %19 = vsyncpa [#allocation7 + $0x1], 0  ;;  %s1391_s18 = smov 0   ;;  %s1393_s19 = smov 0  }
   0x8   :  { %s1395_s20 = smov 0   ;;  %s1397_s21 = smov 0  }
   0x9   :  { %s1399_s22 = smov 0   ;;  %s1401_s23 = smov 0  }
   0xa   :  { %s1403_s24 = smov 0   ;;  %s1405_s25 = smov 0  }
   0xb LB: > { %1819 = sst [smem:[#allocation12_spill]] %s1320_s18  ;;  %s1432_s26 = sadd.s32 4294967295, %s1348_s25   ;;  %s1348_s25 = sphi %s1405_s25, %s25_s25   ;;  %s1344_s24 = sphi %s1403_s24, %s1844_s24   ;;  %s1340_s23 = sphi %s1401_s23, %s1843_s23   ;;  %s1336_s22 = sphi %s1399_s22, %s1842_s22   ;;  %s1332_s21 = sphi %s1397_s21, %s1841_s21   ;;  %s1328_s20 = sphi %s1395_s20, %s1840_s20   ;;  %s1324_s19 = sphi %s1393_s19, %s1839_s19   ;;  %s1320_s18 = sphi %s1391_s18, %s1838_s18  }
   0xc   : > { %s1815_s27 = sadd.s32 4294967294, %s1348_s25   ;;  %s34_s28 = sadd.s32 1, %s1340_s23 }
   0xd   : > { %s37_s29 = sadd.s32 1, %s1344_s24  ;;  %p35_p0 = scmp.ge.s32.totalorder %s34_s28, 2 }
   0xe   : > { %s46_s30 = sadd.s32 1, %s1328_s20  ;;  %p53_p1 = scmp.ne.s32.totalorder %s1328_s20, %s1324_s19 }
   0xf   : > { %p54_p2 = scmp.eq.s32.totalorder %s1348_s25, 0  ;;  %s1846_s28 = smov (%p35_p0, %s34_s28), 0 }
  0x10   : > { %1820 = sst [smem:[#allocation13_spill]] %s1846_s28  ;;  %s1848_s29 = smov (!%p35_p0, %s37_s29), %s1344_s24 }
  0x11   : > { %s42_s6 = ssub.s32 %s1340_s23, %s1846_s28  ;;  %p1446_p3 = por %p54_p2, %p53_p1 }
  0x12   : > { %p39_p4 = scmp.ge.s32.totalorder %s1848_s29, 2  ;;  %p59_p5 = scmp.ne.s32.totalorder %s1324_s19, %s1320_s18 }
  0x13   : > { %p60_p6 = scmp.eq.s32.totalorder %s1432_s26, 0  ;;  %p127_p7 = scmp.eq.s32.totalorder %s1432_s26, 3 }
  0x14   : > { %s1850_s29 = smov (%p39_p4, %s1848_s29), 0  ;;  %p133_p10 = scmp.eq.s32.totalorder %s1815_s27, 3 }
  0x15   : > { %1822 = sst [smem:[#allocation14_spill]] %s1850_s29  ;;  %p1456_p8 = por %p60_p6, %p59_p5 }
  0x16   : > { %p1460_p9 = por %p127_p7, %p53_p1  ;;  %s41_s10 = ssub.s32 %s1344_s24, %s1850_s29 }
  0x17   : > { %s43_s11 = sor.u32 %s42_s6, %s41_s10  ;;  %p1468_p12 = por %p133_p10, %p59_p5 }
  0x18   : > { %s1824_s9 = scalar_select %p1460_p9, 1, 0 }
  0x19   : > { %p44_p11 = scmp.eq.s32.totalorder %s43_s11, 0  ;;  %p1080_p13 = scmp.lt.s32.totalorder %s1348_s25, 4 }
  0x1a   : > { %s1825_s12 = scalar_select %p1468_p12, 1, 0 }
  0x1b   : > { %s215_s13 = sand.u32 1, %s1328_s20   ;;  %s981_s16 = sshll.u32 %s1340_s23, 2 }
  0x1c   : > { %s1475_s14 = scalar_select %p44_p11, %s1328_s20, %s46_s30  }
  0x1d   : > { %s980_s15 = sshll.u32 %s215_s13, 8  ;;  %s982_s17 = sshll.u32 %s1344_s24, 6 }
  0x1e   : > { %s219_s28 = scalar_lea.vmem [#allocation2], %s980_s15  ;;  %s225_s29 = sadd.s32 %s982_s17, %s981_s16 }
  0x1f   : > { %s228_s18 = sshll.u32 %s219_s28, 4  ;;  %s983_s27 = sshll.u32 %s225_s29, 7  ;;  %s1479_s18 = int_to_ptr.vmem [resolvable:$true] %s228_s18 }
  0x20   : > { %p1483_p0 = pnand %p1080_p13, %p1446_p3  ;;  %s1827_s0 = sld [smem:[#allocation15_spill]] }
  0x21   : > { %s1493_s28 = scalar_lea.sflag [#allocation3], %s215_s13 }
  0x22   : > { %p1162_p3 = pneg %p1483_p0 }
  0x26   : > { %s1490_s30 = scalar_lea.hbm %s1827_s0, %s983_s27  ;;  %s1165_s27 = scalar_lea.hbm %s1827_s0, 16384 }
  0x27   : > { %s1160_s29 = scalar_lea.hbm %s1490_s30, 4096  ;;  %p1166_p6 = scmp.lt.u32.totalorder %s1490_s30, %s1827_s0 }
  0x28   : > { %p1161_p2 = scmp.ne.s32.totalorder %s1490_s30, %s1160_s29  ;;  %p1167_p7 = scmp.lt.u32.totalorder %s1165_s27, %s1160_s29 }
  0x29   : > { %p1169_p11 = scmp.lt.u32.totalorder %s1160_s29, %s1490_s30 }
  0x2a   : > { %p1163_p4 = pnand %p1162_p3, %p1161_p2  ;;  %p1168_p10 = por %p1167_p7, %p1166_p6 }
  0x2c   : > { %p1164_p5 = pneg %p1163_p4  ;;  %p1170_p13 = por %p1169_p11, %p1168_p10 }
  0x2e   : > { %p1171_p1 = pnand %p1170_p13, %p1164_p5 }
  0x30   : > { %1174 = shalt.err (!%p1171_p1)
}
  0x31   : > { %s1175_s13 = scalar_lea.vmem %s1479_s18, 4096  ;;  %s1350_s10 = smov [#allocation2]  }
  0x32   : > { %p1176_p2 = scmp.ne.s32.totalorder %s1479_s18, %s1175_s13  ;;  %s1180_s11 = sshll.u32 %s1350_s10, 4  ;;  %s1181_s11 = int_to_ptr.vmem [resolvable:$false] %s1180_s11 }
  0x33   : > { %s1182_s7 = scalar_lea.vmem %s1181_s11, 8192  ;;  %p1183_p9 = scmp.lt.s32.totalorder %s1479_s18, %s1181_s11 }
  0x34   : > { %p1178_p4 = pnand %p1176_p2, %p1162_p3  ;;  %p1184_p6 = scmp.lt.s32.totalorder %s1182_s7, %s1175_s13 }
  0x36   : > { %p1179_p12 = pneg %p1178_p4  ;;  %p1185_p7 = por %p1184_p6, %p1183_p9 }
  0x38   : > { %p1186_p10 = pnand %p1185_p7, %p1179_p12 }
  0x3a   : > { %1189 = shalt.err (!%p1186_p10)
}
  0x3b   : > { %s1351_s29 = smov 1024   ;;  %s1352_s15 = smov 512  }
  0x3c   : > { %s1353_s27 = smov 32   ;;  %p236_p1 = scmp.lt.s32.totalorder %s1348_s25, 5 }
  0x3d   : > { %1069 = dma.hbm_to_vmem [thread:$0]  (!%p1483_p0), %s1490_s30, 4096, %s1479_s18, %s1493_s28, %s1351_s29, %s1352_s15, %s1353_s27  }
  0x3e   : > { %p1828_p3 = scmp.ge.s32.totalorder %s1348_s25, 1 }
  0x40   : > { %p237_p5 = pnand %p1828_p3, %p236_p1 }
  0x41   : > { %s1525_s16 = sand.u32 (!%p237_p5), 1, %s1324_s19  }
  0x42   : > { %240 = sbr.rel (%p237_p5) target bundleno = 394 (0x18a), region = 32  ;;  %s985_s17 = sshll.u32 (!%p237_p5), %s1525_s16, 8 }
  0x43   : > { %s243_s13 = scalar_lea.sflag (!%p237_p5), [#allocation3], %s1525_s16  ;;  %s1529_s10 = scalar_lea.vmem (!%p237_p5), [#allocation2], %s985_s17 }
  0x49   : > { %1307 = dma.done.wait (%p1456_p8), %s243_s13, 4096  }
  0x4a   : > { %1309 = vsyncadd (%p1456_p8), %s243_s13, 4294963200  ;;  %v1354_v0 = vmov 0   ;;  %v289_v1 = vld [vmem:[%s1529_s10 + $0x8] sm:$0xff]  ;;  %v291_v3 = vld [vmem:[%s1529_s10 + $0x18] sm:$0xff]  ;;  %vm431_vm0 = vcmask 523264   ;;  %s1817_s28 = sshll.u32 %s1332_s21, 2 }
  0x4b   : > { %479 = vmatprep.mubr.bf16.mxu0 %v1354_v0  ;;  %562 = vmatprep.mubr.bf16.mxu1 %v1354_v0  ;;  %v293_v2 = vld [vmem:[%s1529_s10 + $0x28] sm:$0xff]  ;;  %v295_v5 = vld [vmem:[%s1529_s10 + $0x38] sm:$0xff]  ;;  %v288_v6 = vld [vmem:[%s1529_s10] sm:$0xff]  ;;  %s1028_s11 = sshll.u32 %s1336_s22, 3  ;;  %s986_s7 = sshll.u32 %s1525_s16, 4 }
  0x4c   : > { %1153 = vset.pattern.permute.xlu0 %v1354_v0  ;;  %1154 = vset.pattern.permute.xlu1 %v1354_v0  ;;  %v321_v4 = vpack.c.bf16 %v293_v2, %v289_v1  ;;  %v292_v7 = vld [vmem:[%s1529_s10 + $0x20] sm:$0xff]  ;;  %v323_v8 = vpack.c.bf16 %v295_v5, %v291_v3  ;;  %v290_v10 = vld [vmem:[%s1529_s10 + $0x10] sm:$0xff]  ;;  %v297_v12 = vld [vmem:[%s1529_s10 + $0x48] sm:$0xff]  ;;  %s1639_s29 = sadd.s32 %s1028_s11, %s1817_s28  ;;  %s268_s27 = scalar_lea.vmem [#allocation5], %s986_s7 }
  0x4d   : > { %v320_v9 = vpack.c.bf16 %v292_v7, %v288_v6  ;;  %v294_v11 = vld [vmem:[%s1529_s10 + $0x30] sm:$0xff]  ;;  %v301_v14 = vld [vmem:[%s1529_s10 + $0x68] sm:$0xff]  ;;  %v299_v15 = vld [vmem:[%s1529_s10 + $0x58] sm:$0xff]  ;;  %s1029_s15 = sshll.u32 %s1639_s29, 6  ;;  %s788_s17 = sshll.u32 %s268_s27, 4  ;;  %s1653_s17 = int_to_ptr.vmem [resolvable:$true] %s788_s17 }
  0x4e   : > { %447 = vmatprep.subr.bf16.mxu0 %v321_v4  ;;  %v322_v13 = vpack.c.bf16 %v294_v11, %v290_v10  ;;  %v303_v16 = vld [vmem:[%s1529_s10 + $0x78] sm:$0xff]  ;;  %530 = vmatprep.subr.bf16.mxu1 %v323_v8  ;;  %v325_v17 = vpack.c.bf16 %v301_v14, %v297_v12  ;;  %v296_v19 = vld [vmem:[%s1529_s10 + $0x40] sm:$0xff]  ;;  %v298_v21 = vld [vmem:[%s1529_s10 + $0x50] sm:$0xff]  ;;  %s1651_s30 = scalar_lea.hbm %s1809_s3, %s1029_s15  ;;  %s1659_s28 = scalar_lea.hbm %s1810_s4, %s1029_s15 }
  0x4f   : > { %448 = vmatpush1.bf16.msra.mxu0 %v320_v9  ;;  %v327_v18 = vpack.c.bf16 %v303_v16, %v299_v15  ;;  %v300_v20 = vld [vmem:[%s1529_s10 + $0x60] sm:$0xff]  ;;  %v302_v23 = vld [vmem:[%s1529_s10 + $0x70] sm:$0xff]  ;;  %v305_v24 = vld [vmem:[%s1529_s10 + $0x88] sm:$0xff]  ;;  %s762_s8 = scalar_lea.sflag [#allocation4], %s1525_s16  ;;  %s1190_s6 = scalar_lea.vmem %s1653_s17, 256 }
  0x50   : > { %531 = vmatpush1.bf16.msra.mxu1 %v322_v13  ;;  %v324_v22 = vpack.c.bf16 %v300_v20, %v296_v19  ;;  %v309_v25 = vld [vmem:[%s1529_s10 + $0xa8] sm:$0xff]  ;;  %449 = vmatprep.subr.bf16.mxu0 %v325_v17  ;;  %v326_v26 = vpack.c.bf16 %v302_v23, %v298_v21  ;;  %v307_v28 = vld [vmem:[%s1529_s10 + $0x98] sm:$0xff]  ;;  %v304_v30 = vld [vmem:[%s1529_s10 + $0x80] sm:$0xff]  ;;  %p1191_p8 = scmp.ne.s32.totalorder %s1653_s17, %s1190_s6  ;;  %p1829_p9 = scmp.ne.s32.totalorder %s1824_s9, 0 }
  0x51   : > { %532 = vmatprep.subr.bf16.mxu1 %v327_v18  ;;  %v329_v27 = vpack.c.bf16 %v309_v25, %v305_v24  ;;  %v311_v29 = vld [vmem:[%s1529_s10 + $0xb8] sm:$0xff]  ;;  %v308_v32 = vld [vmem:[%s1529_s10 + $0xa0] sm:$0xff]  ;;  %v306_v33 = vld [vmem:[%s1529_s10 + $0x90] sm:$0xff] }
  0x52   : > { %v331_v31 = vpack.c.bf16 %v311_v29, %v307_v28  ;;  %v310_v34 = vld [vmem:[%s1529_s10 + $0xb0] sm:$0xff]  ;;  %v328_v35 = vpack.c.bf16 %v308_v32, %v304_v30  ;;  %v313_v36 = vld [vmem:[%s1529_s10 + $0xc8] sm:$0xff]  ;;  %v315_v38 = vld [vmem:[%s1529_s10 + $0xd8] sm:$0xff]  ;;  %p1192_p12 = pnand %p1191_p8, %p1829_p9 }
  0x53   : > { %450 = vmatpush1.bf16.msra.mxu0 %v324_v22  ;;  %v317_v37 = vld [vmem:[%s1529_s10 + $0xe8] sm:$0xff]  ;;  %v330_v39 = vpack.c.bf16 %v310_v34, %v306_v33  ;;  %v319_v41 = vld [vmem:[%s1529_s10 + $0xf8] sm:$0xff]  ;;  %v312_v42 = vld [vmem:[%s1529_s10 + $0xc0] sm:$0xff] }
  0x54   : > { %533 = vmatpush1.bf16.msra.mxu1 %v326_v26  ;;  %451 = vmatprep.subr.bf16.mxu0 %v329_v27  ;;  %v333_v40 = vpack.c.bf16 %v317_v37, %v313_v36  ;;  %v316_v43 = vld [vmem:[%s1529_s10 + $0xe0] sm:$0xff]  ;;  %v335_v44 = vpack.c.bf16 %v319_v41, %v315_v38  ;;  %v314_v45 = vld [vmem:[%s1529_s10 + $0xd0] sm:$0xff]  ;;  %v347_v50 = vld [vmem:[%s1808_s2 + $0x8] sm:$0xff]  ;;  %p1193_p0 = pneg %p1192_p12 }
  0x55   : > { %534 = vmatprep.subr.bf16.mxu1 %v331_v31  ;;  %v318_v46 = vld [vmem:[%s1529_s10 + $0xf0] sm:$0xff]  ;;  %v332_v47 = vpack.c.bf16 %v316_v43, %v312_v42  ;;  %v1155_v49 = vld [vmem:[%s1807_s1] sm:$0xff]   ;;  %363 = vperm.xlu0 %1153, %v347_v50   ;;  %v349_v53 = vld [vmem:[%s1808_s2 + $0x18] sm:$0xff]  ;;  %s1645_s10 = scalar_lea.vmem [#allocation6], %s986_s7 }
  0x56   : > { %v334_v48 = vpack.c.bf16 %v318_v46, %v314_v45  ;;  %v348_v51 = vld [vmem:[%s1808_s2 + $0x10] sm:$0xff]  ;;  %v346_v52 = vld [vmem:[%s1808_s2] sm:$0xff]  ;;  %v1156_v55 = vld [vmem:[%s1807_s1 + $0x8] sm:$0xff]   ;;  %s804_s18 = sshll.u32 %s1645_s10, 4  ;;  %s1661_s18 = int_to_ptr.vmem [resolvable:$true] %s804_s18 }
  0x57   : > { %452 = vmatpush1.bf16.msra.mxu0 %v328_v35  ;;  %368 = vperm.xlu1 %1154, %v348_v51   ;;  %v350_v54 = vld [vmem:[%s1808_s2 + $0x20] sm:$0xff]  ;;  %v351_v56 = vld [vmem:[%s1808_s2 + $0x28] sm:$0xff]  ;;  %v352_v57 = vld [vmem:[%s1808_s2 + $0x30] sm:$0xff] }
  0x58   : > { %535 = vmatpush1.bf16.msra.mxu1 %v330_v39  ;;  %453 = vmatprep.subr.bf16.mxu0 %v333_v40  ;;  %v353_v58 = vld [vmem:[%s1808_s2 + $0x38] sm:$0xff]  ;;  %v354_v59 = vld [vmem:[%s1808_s2 + $0x40] sm:$0xff]  ;;  %v1157_v60 = vld [vmem:[%s1807_s1 + $0x10] sm:$0xff]  }
  0x59   : > { %536 = vmatprep.subr.bf16.mxu1 %v335_v44  ;;  %358 = vperm.xlu0 %1153, %v346_v52   ;;  %v355_v61 = vld [vmem:[%s1808_s2 + $0x48] sm:$0xff]  ;;  %v1158_v62 = vld [vmem:[%s1807_s1 + $0x18] sm:$0xff]   ;;  %v1159_v63 = vld [vmem:[%s1807_s1 + $0x20] sm:$0xff]  }
  0x5b   : > { %454 = vmatpush1.bf16.msra.mxu0 %v332_v47  ;;  %373 = vperm.xlu1 %1154, %v349_v53  }
  0x5c   : > { %537 = vmatpush1.bf16.msra.mxu1 %v334_v48 }
  0x5d   : > { %378 = vperm.xlu0 %1153, %v350_v54  }
  0x5e   : > { %994 = vmatmul.mubr.msk.bf16.vlgmr.msra.gmra.mrb[0].mxu0 %vm431_vm0, %v1155_v49 }
  0x5f   : > { %999 = vmatmul.mubr.msk.bf16.vlgmr.msra.gmra.mrb[0].mxu1 %vm431_vm0, %v1155_v49  ;;  %489 = vmatprep.mubr.bf16.mxu0 %v1354_v0 }
  0x60   : > { %572 = vmatprep.mubr.bf16.mxu1 %v1354_v0  ;;  %383 = vperm.xlu1 %1154, %v351_v56  }
  0x61   : > { %388 = vperm.xlu0 %1153, %v352_v57  }
  0x64   : > { %393 = vperm.xlu1 %1154, %v353_v58  }
  0x65   : > { %398 = vperm.xlu0 %1153, %v354_v59  }
  0x66   : > { %995 = vmatmul.mubr.msk.bf16.gmra.mrb[4].mxu0 %vm431_vm0, %v1156_v55 }
  0x67   : > { %1000 = vmatmul.mubr.msk.bf16.gmra.mrb[4].mxu1 %vm431_vm0, %v1156_v55  ;;  %499 = vmatprep.mubr.bf16.mxu0 %v1354_v0 }
  0x68   : > { %582 = vmatprep.mubr.bf16.mxu1 %v1354_v0  ;;  %403 = vperm.xlu1 %1154, %v355_v61  }
  0x6e   : > { %996 = vmatmul.mubr.msk.bf16.gmra.mrb[8].mxu0 %vm431_vm0, %v1157_v60 }
  0x6f   : > { %1001 = vmatmul.mubr.msk.bf16.gmra.mrb[8].mxu1 %vm431_vm0, %v1157_v60  ;;  %509 = vmatprep.mubr.bf16.mxu0 %v1354_v0 }
  0x70   : > { %592 = vmatprep.mubr.bf16.mxu1 %v1354_v0 }
  0x76   : > { %997 = vmatmul.mubr.msk.bf16.gmra.mrb[12].mxu0 %vm431_vm0, %v1158_v62 }
  0x77   : > { %1002 = vmatmul.mubr.msk.bf16.gmra.mrb[12].mxu1 %vm431_vm0, %v1158_v62  ;;  %519 = vmatprep.mubr.bf16.mxu0 %v1354_v0 }
  0x78   : > { %602 = vmatprep.mubr.bf16.mxu1 %v1354_v0 }
  0x7e   : > { %998 = vmatmul.mubr.msk.bf16.gmra.mrb[16].mxu0 %vm431_vm0, %v1159_v63 }
  0x7f   : > { %1003 = vmatmul.mubr.msk.bf16.gmra.mrb[16].mxu1 %vm431_vm0, %v1159_v63 }
  0xd4   : > { %v364_v1 = vpop.permute.xlu0 %363 }
  0xd6   : > { %v1641_v0 = vpop.permute.xlu1 %368 }
  0xd8   : > { %v359_v2 = vpop.permute.xlu0 %358 }
  0xda   : > { %v1664_v23 = vpop.permute.xlu1 %373 }
 0x131   : > { %v481_v3 = vpop.f32.mrb[0].mxu0 }
 0x132   : > { %v482_v4 = vadd.f32 %v481_v3, %v359_v2  ;;  %v564_v5 = vpop.f32.mrb[0].mxu1  ;;  %v483_v6 = vpop.f32.mrb[1].mxu0 }
 0x133   : > { %v565_v7 = vadd.f32 %v564_v5, %v359_v2  ;;  %v484_v8 = vadd.f32 %v483_v6, %v359_v2  ;;  %v566_v9 = vpop.f32.mrb[1].mxu1  ;;  %v485_v10 = vpop.f32.mrb[2].mxu0 }
 0x134   : > { %v567_v11 = vadd.f32 %v566_v9, %v359_v2  ;;  %v486_v12 = vadd.f32 %v485_v10, %v364_v1  ;;  %v568_v13 = vpop.f32.mrb[2].mxu1  ;;  %v487_v14 = vpop.f32.mrb[3].mxu0 }
 0x135   : > { %v1038_v15 = vpack.c.bf16 %v484_v8, %v482_v4  ;;  %v569_v16 = vadd.f32 %v568_v13, %v364_v1  ;;  %v488_v17 = vadd.f32 %v487_v14, %v364_v1  ;;  %v570_v18 = vpop.f32.mrb[3].mxu1 }
 0x136   : > { %v1039_v19 = vpack.c.bf16 %v567_v11, %v565_v7  ;;  %v571_v20 = vadd.f32 %v570_v18, %v364_v1 }
 0x137   : > { %629 = vst [vmem:[%s268_s27] sm:$0xff] %v1038_v15  ;;  %v1040_v21 = vpack.c.bf16 %v488_v17, %v486_v12 }
 0x138   : > { %630 = vst [vmem:[%s268_s27 + $0x8] sm:$0xff] %v1039_v19  ;;  %v1041_v22 = vpack.c.bf16 %v571_v20, %v569_v16  ;;  %s1355_s27 = smov [#allocation5]  }
 0x139   : > { %647 = vst [vmem:[%s1645_s10] sm:$0xff] %v1040_v21  ;;  %v491_v24 = vpop.f32.mrb[4].mxu0  ;;  %s1194_s11 = sshll.u32 %s1355_s27, 4  ;;  %s1195_s11 = int_to_ptr.vmem [resolvable:$false] %s1194_s11 }
 0x13a   : > { %s1196_s13 = scalar_lea.vmem %s1195_s11, 512  ;;  %p1197_p11 = scmp.lt.s32.totalorder %s1653_s17, %s1195_s11 }
 0x13b   : > { %p1198_p13 = scmp.lt.s32.totalorder %s1196_s13, %s1190_s6 }
 0x13d   : > { %p1199_p2 = por %p1198_p13, %p1197_p11 }
 0x13f   : > { %p1200_p4 = pnand %p1199_p2, %p1193_p0 }
 0x141   : > { %1203 = shalt.err (!%p1200_p4)
}
 0x142   : > { %s1204_s15 = scalar_lea.hbm %s1651_s30, 256  ;;  %s1208_s27 = scalar_lea.hbm %s1809_s3, 1024 }
 0x143   : > { %p1205_p6 = scmp.ne.s32.totalorder %s1651_s30, %s1204_s15  ;;  %p1209_p1 = scmp.lt.u32.totalorder %s1651_s30, %s1809_s3 }
 0x144   : > { %p1210_p3 = scmp.lt.u32.totalorder %s1208_s27, %s1204_s15  ;;  %p1212_p8 = scmp.lt.u32.totalorder %s1204_s15, %s1651_s30 }
 0x145   : > { %p1206_p7 = pnand %p1205_p6, %p1829_p9 }
 0x146   : > { %p1211_p5 = por %p1210_p3, %p1209_p1 }
 0x147   : > { %p1207_p10 = pneg %p1206_p7 }
 0x148   : > { %p1213_p12 = por %p1212_p8, %p1211_p5 }
 0x14a   : > { %p1214_p0 = pnand %p1213_p12, %p1207_p10 }
 0x14c   : > { %1217 = shalt.err (!%p1214_p0)
}
 0x14d   : > { %1060 = dma.vmem_to_hbm [thread:$0]  (%p1829_p9), %s1653_s17, 256, %s1651_s30, %s762_s8   ;;  %648 = vst [vmem:[%s1645_s10 + $0x8] sm:$0xff] %v1041_v22  ;;  %v492_v25 = vadd.f32 %v491_v24, %v1641_v0  ;;  %v574_v26 = vpop.f32.mrb[4].mxu1  ;;  %v493_v27 = vpop.f32.mrb[5].mxu0 }
 0x14e   : > { %v575_v28 = vadd.f32 %v574_v26, %v1641_v0  ;;  %v494_v29 = vadd.f32 %v493_v27, %v1641_v0  ;;  %v576_v30 = vpop.f32.mrb[5].mxu1  ;;  %v495_v31 = vpop.f32.mrb[6].mxu0  ;;  %s1830_s0 = sand.u32 1, %s1432_s26   ;;  %s1218_s6 = scalar_lea.vmem %s1661_s18, 256 }
 0x14f   : > { %s1694_s13 = scalar_lea.sflag [#allocation7], %s1830_s0  ;;  %p1219_p11 = scmp.ne.s32.totalorder %s1661_s18, %s1218_s6 }
 0x150   : > { %s1356_s17 = smov [#allocation6]  }
 0x151   : > { %p1220_p13 = pnand %p1219_p11, %p1829_p9  ;;  %s1222_s10 = sshll.u32 %s1356_s17, 4  ;;  %s1223_s10 = int_to_ptr.vmem [resolvable:$false] %s1222_s10 }
 0x152   : > { %s1224_s30 = scalar_lea.vmem %s1223_s10, 512  ;;  %p1225_p4 = scmp.lt.s32.totalorder %s1661_s18, %s1223_s10 }
 0x153   : > { %p1221_p2 = pneg %p1220_p13  ;;  %p1226_p6 = scmp.lt.s32.totalorder %s1224_s30, %s1218_s6 }
 0x155   : > { %p1227_p7 = por %p1226_p6, %p1225_p4 }
 0x157   : > { %p1228_p10 = pnand %p1227_p7, %p1221_p2 }
 0x159   : > { %1231 = shalt.err (!%p1228_p10)
}
 0x15a   : > { %s1232_s26 = scalar_lea.hbm %s1659_s28, 256  ;;  %s1236_s7 = scalar_lea.hbm %s1810_s4, 1024 }
 0x15b   : > { %p1233_p1 = scmp.ne.s32.totalorder %s1659_s28, %s1232_s26  ;;  %p1237_p8 = scmp.lt.u32.totalorder %s1659_s28, %s1810_s4 }
 0x15c   : > { %p1238_p12 = scmp.lt.u32.totalorder %s1236_s7, %s1232_s26  ;;  %p1240_p11 = scmp.lt.u32.totalorder %s1232_s26, %s1659_s28 }
 0x15d   : > { %p1234_p3 = pnand %p1233_p1, %p1829_p9 }
 0x15e   : > { %p1239_p0 = por %p1238_p12, %p1237_p8 }
 0x15f   : > { %p1235_p5 = pneg %p1234_p3 }
 0x160   : > { %p1241_p13 = por %p1240_p11, %p1239_p0 }
 0x162   : > { %p1242_p2 = pnand %p1241_p13, %p1235_p5 }
 0x164   : > { %1245 = shalt.err (!%p1242_p2)
}
 0x165   : > { %1061 = dma.vmem_to_hbm [thread:$0]  (%p1829_p9), %s1661_s18, 256, %s1659_s28, %s1694_s13   ;;  %v577_v32 = vadd.f32 %v576_v30, %v1641_v0  ;;  %v496_v33 = vadd.f32 %v495_v31, %v1664_v23  ;;  %v578_v34 = vpop.f32.mrb[6].mxu1  ;;  %v497_v35 = vpop.f32.mrb[7].mxu0  ;;  %v1042_v36 = vpack.c.bf16 %v494_v29, %v492_v25 }
 0x166   : > { %v579_v37 = vadd.f32 %v578_v34, %v1664_v23  ;;  %v498_v38 = vadd.f32 %v497_v35, %v1664_v23  ;;  %v580_v39 = vpop.f32.mrb[7].mxu1  ;;  %s1831_s11 = sshll.u32 %s1525_s16, 7  ;;  %v379_v43 = vpop.permute.xlu0 %378  ;;  %s1034_s16 = sshll.u32 %s1336_s22, 6 }
 0x167   : > { %v1043_v40 = vpack.c.bf16 %v577_v32, %v575_v28  ;;  %v581_v41 = vadd.f32 %v580_v39, %v1664_v23  ;;  %s1725_s0 = scalar_lea.vmem [#allocation8], %s1831_s11  ;;  %v384_v45 = vpop.permute.xlu1 %383  ;;  %v501_v46 = vpop.f32.mrb[8].mxu0  ;;  %s1832_s28 = sshll.u32 %s1332_s21, 2 }
 0x168   : > { %745 = vst [vmem:[%s1725_s0] sm:$0xff] %v1042_v36  ;;  %v1044_v42 = vpack.c.bf16 %v498_v38, %v496_v33  ;;  %v502_v47 = vadd.f32 %v501_v46, %v379_v43  ;;  %v584_v48 = vpop.f32.mrb[8].mxu1  ;;  %v503_v49 = vpop.f32.mrb[9].mxu0  ;;  %s816_s18 = sadd.s32 %s1034_s16, %s1832_s28  ;;  %s819_s21 = sshll.u32 %s1725_s0, 4  ;;  %s1749_s21 = int_to_ptr.vmem [resolvable:$true] %s819_s21 }
 0x169   : > { %746 = vst [vmem:[%s1725_s0 + $0x8] sm:$0xff] %v1043_v40  ;;  %v1045_v44 = vpack.c.bf16 %v581_v41, %v579_v37  ;;  %v585_v50 = vadd.f32 %v584_v48, %v379_v43  ;;  %v504_v51 = vadd.f32 %v503_v49, %v379_v43  ;;  %v586_v52 = vpop.f32.mrb[9].mxu1  ;;  %v505_v53 = vpop.f32.mrb[10].mxu0  ;;  %s1035_s22 = sshll.u32 %s816_s18, 6  ;;  %s1246_s30 = scalar_lea.vmem %s1749_s21, 2048 }
 0x16a   : > { %747 = vst [vmem:[%s1725_s0 + $0x10] sm:$0xff] %v1044_v42  ;;  %v587_v54 = vadd.f32 %v586_v52, %v379_v43  ;;  %v506_v55 = vadd.f32 %v505_v53, %v384_v45  ;;  %v588_v56 = vpop.f32.mrb[10].mxu1  ;;  %v507_v57 = vpop.f32.mrb[11].mxu0  ;;  %s1746_s10 = scalar_lea.hbm %s1811_s5, %s1035_s22  ;;  %p1247_p4 = scmp.ne.s32.totalorder %s1749_s21, %s1246_s30 }
 0x16b   : > { %748 = vst [vmem:[%s1725_s0 + $0x18] sm:$0xff] %v1045_v44  ;;  %v1046_v58 = vpack.c.bf16 %v504_v51, %v502_v47  ;;  %v589_v59 = vadd.f32 %v588_v56, %v384_v45  ;;  %v508_v60 = vadd.f32 %v507_v57, %v384_v45  ;;  %v590_v61 = vpop.f32.mrb[11].mxu1  ;;  %v389_v2 = vpop.permute.xlu0 %388  ;;  %s1357_s26 = smov [#allocation8]  }
 0x16c   : > { %v1047_v62 = vpack.c.bf16 %v587_v54, %v585_v50  ;;  %v591_v63 = vadd.f32 %v590_v61, %v384_v45  ;;  %v394_v0 = vpop.permute.xlu1 %393  ;;  %v511_v4 = vpop.f32.mrb[12].mxu0  ;;  %p1248_p6 = pnand %p1247_p4, %p1829_p9  ;;  %s1250_s8 = sshll.u32 %s1357_s26, 4  ;;  %s1251_s8 = int_to_ptr.vmem [resolvable:$false] %s1250_s8 }
 0x16d   : > { %749 = vst [vmem:[%s1725_s0 + $0x20] sm:$0xff] %v1046_v58  ;;  %v1048_v1 = vpack.c.bf16 %v508_v60, %v506_v55  ;;  %v512_v5 = vadd.f32 %v511_v4, %v389_v2  ;;  %v594_v6 = vpop.f32.mrb[12].mxu1  ;;  %v513_v7 = vpop.f32.mrb[13].mxu0  ;;  %s1252_s15 = scalar_lea.vmem %s1251_s8, 4096  ;;  %p1253_p10 = scmp.lt.s32.totalorder %s1749_s21, %s1251_s8 }
 0x16e   : > { %750 = vst [vmem:[%s1725_s0 + $0x28] sm:$0xff] %v1047_v62  ;;  %v1049_v3 = vpack.c.bf16 %v591_v63, %v589_v59  ;;  %v595_v8 = vadd.f32 %v594_v6, %v389_v2  ;;  %v514_v9 = vadd.f32 %v513_v7, %v389_v2  ;;  %v596_v10 = vpop.f32.mrb[13].mxu1  ;;  %v515_v11 = vpop.f32.mrb[14].mxu0  ;;  %p1249_p7 = pneg %p1248_p6  ;;  %p1254_p1 = scmp.lt.s32.totalorder %s1252_s15, %s1246_s30 }
 0x16f   : > { %751 = vst [vmem:[%s1725_s0 + $0x30] sm:$0xff] %v1048_v1  ;;  %v597_v12 = vadd.f32 %v596_v10, %v389_v2  ;;  %v516_v13 = vadd.f32 %v515_v11, %v394_v0  ;;  %v598_v14 = vpop.f32.mrb[14].mxu1  ;;  %v517_v15 = vpop.f32.mrb[15].mxu0 }
 0x170   : > { %752 = vst [vmem:[%s1725_s0 + $0x38] sm:$0xff] %v1049_v3  ;;  %v1050_v16 = vpack.c.bf16 %v514_v9, %v512_v5  ;;  %v599_v17 = vadd.f32 %v598_v14, %v394_v0  ;;  %v518_v18 = vadd.f32 %v517_v15, %v394_v0  ;;  %v600_v19 = vpop.f32.mrb[15].mxu1  ;;  %v399_v23 = vpop.permute.xlu0 %398  ;;  %p1255_p3 = por %p1254_p1, %p1253_p10 }
 0x171   : > { %v1051_v20 = vpack.c.bf16 %v597_v12, %v595_v8  ;;  %v601_v21 = vadd.f32 %v600_v19, %v394_v0  ;;  %v404_v25 = vpop.permute.xlu1 %403  ;;  %v521_v26 = vpop.f32.mrb[16].mxu0 }
 0x172   : > { %753 = vst [vmem:[%s1725_s0 + $0x40] sm:$0xff] %v1050_v16  ;;  %v1052_v22 = vpack.c.bf16 %v518_v18, %v516_v13  ;;  %v522_v27 = vadd.f32 %v521_v26, %v399_v23  ;;  %v604_v28 = vpop.f32.mrb[16].mxu1  ;;  %v523_v29 = vpop.f32.mrb[17].mxu0  ;;  %p1256_p5 = pnand %p1255_p3, %p1249_p7 }
 0x173   : > { %754 = vst [vmem:[%s1725_s0 + $0x48] sm:$0xff] %v1051_v20  ;;  %v1053_v24 = vpack.c.bf16 %v601_v21, %v599_v17  ;;  %v605_v30 = vadd.f32 %v604_v28, %v399_v23  ;;  %v524_v31 = vadd.f32 %v523_v29, %v399_v23  ;;  %v606_v32 = vpop.f32.mrb[17].mxu1  ;;  %v525_v33 = vpop.f32.mrb[18].mxu0 }
 0x174   : > { %755 = vst [vmem:[%s1725_s0 + $0x50] sm:$0xff] %v1052_v22  ;;  %v607_v34 = vadd.f32 %v606_v32, %v399_v23  ;;  %v526_v35 = vadd.f32 %v525_v33, %v404_v25  ;;  %v608_v36 = vpop.f32.mrb[18].mxu1  ;;  %v527_v37 = vpop.f32.mrb[19].mxu0 }
 0x175   : > { %756 = vst [vmem:[%s1725_s0 + $0x58] sm:$0xff] %v1053_v24  ;;  %v1054_v38 = vpack.c.bf16 %v524_v31, %v522_v27  ;;  %v609_v39 = vadd.f32 %v608_v36, %v404_v25  ;;  %v528_v40 = vadd.f32 %v527_v37, %v404_v25  ;;  %v610_v41 = vpop.f32.mrb[19].mxu1 }
 0x176   : > { %v1055_v42 = vpack.c.bf16 %v607_v34, %v605_v30  ;;  %v611_v43 = vadd.f32 %v610_v41, %v404_v25 }
 0x177   : > { %757 = vst [vmem:[%s1725_s0 + $0x60] sm:$0xff] %v1054_v38  ;;  %v1056_v44 = vpack.c.bf16 %v528_v40, %v526_v35 }
 0x178   : > { %758 = vst [vmem:[%s1725_s0 + $0x68] sm:$0xff] %v1055_v42  ;;  %v1057_v45 = vpack.c.bf16 %v611_v43, %v609_v39 }
 0x179   : > { %759 = vst [vmem:[%s1725_s0 + $0x70] sm:$0xff] %v1056_v44 }
 0x17a   : > { %760 = vst [vmem:[%s1725_s0 + $0x78] sm:$0xff] %v1057_v45 }
 0x17b   : > { %1259 = shalt.err (!%p1256_p5)
}
 0x17c   : > { %s1260_s7 = scalar_lea.hbm %s1746_s10, 2048  ;;  %s1264_s11 = scalar_lea.hbm %s1811_s5, 8192 }
 0x17d   : > { %p1261_p8 = scmp.ne.s32.totalorder %s1746_s10, %s1260_s7  ;;  %p1265_p11 = scmp.lt.u32.totalorder %s1746_s10, %s1811_s5 }
 0x17e   : > { %p1266_p13 = scmp.lt.u32.totalorder %s1264_s11, %s1260_s7  ;;  %p1268_p4 = scmp.lt.u32.totalorder %s1260_s7, %s1746_s10 }
 0x17f   : > { %p1262_p12 = pnand %p1261_p8, %p1829_p9 }
 0x180   : > { %p1267_p2 = por %p1266_p13, %p1265_p11 }
 0x181   : > { %p1263_p0 = pneg %p1262_p12 }
 0x182   : > { %p1269_p6 = por %p1268_p4, %p1267_p2 }
 0x184   : > { %p1270_p7 = pnand %p1269_p6, %p1263_p0 }
 0x186   : > { %1273 = shalt.err (!%p1270_p7)
}
 0x187   : > { %s1358_s28 = smov 256   ;;  %s1359_s18 = smov 512  }
 0x188   : > { %s1360_s22 = smov 16  }
 0x189   : > { %1062 = dma.vmem_to_hbm [thread:$0]  (%p1829_p9), %s1749_s21, 2048, %s1746_s10, %s1694_s13, %s1358_s28, %s1359_s18, %s1360_s22  }
 0x18a PF: > { %s1833_s6 = sld [smem:[#allocation12_spill]]  ;;  %p1081_p10 = scmp.ge.s32.totalorder %s1348_s25, 2 }
 0x18b   : > { %p1834_p1 = scmp.ne.s32.totalorder %s1825_s12, 0 }
 0x18d   : > { %p1071_p3 = pnand %p1081_p10, %p1834_p1 }
 0x190   : > { %s834_s17 = sand.u32 1, %s1833_s6  }
 0x191   : > { %s835_s30 = scalar_lea.sflag [#allocation4], %s834_s17 }
 0x192   : > { %1311 = dma.done.wait (!%p1071_p3), %s835_s30, 256  }
 0x193   : > { %1313 = vsyncadd (!%p1071_p3), %s835_s30, 4294967040  ;;  %s1835_s26 = sadd.s32 4294967294, %s1348_s25  }
 0x194   : > { %s843_s8 = sand.u32 1, %s1835_s26  }
 0x195   : > { %s844_s15 = scalar_lea.sflag [#allocation7], %s843_s8 }
 0x196   : > { %1315 = dma.done.wait (!%p1071_p3), %s844_s15, 2304  }
 0x197   : > { %1317 = vsyncadd (!%p1071_p3), %s844_s15, 4294964992  ;;  %s25_s25 = sadd.s32 1, %s1348_s25   ;;  %s1836_s9 = sld [smem:[#allocation13_spill]] }
 0x198   : > { %p22_p9 = scmp.ge.s32.totalorder %s25_s25, 6   ;;  %s1837_s12 = sld [smem:[#allocation14_spill]] }
 0x199   : > { %s1838_s18 = smov %s1324_s19  ;;  %s1839_s19 = smov %s1328_s20 }
 0x19a   : > { %s1840_s20 = smov %s1475_s14  ;;  %s1841_s21 = smov %s1340_s23 }
 0x19b   : > { %s1842_s22 = smov %s1344_s24  ;;  %24 = sbr.rel (!%p22_p9) target bundleno = 11 (0xb), region = 109 }
 0x19d   : > { %s1843_s23 = smov %s1836_s9 }
 0x19e   : > { %s1844_s24 = smov %s1837_s12 }
 0x1a2   :  { %858 = vsyncpa [#allocation3], 1 }
 0x1a3   :  { %860 = vsyncpa [#allocation3 + $0x1], 1 }
 0x1a4   :  { %861 = vsyncpa [#allocation4], 1 }
 0x1a5   :  { %863 = vsyncpa [#allocation4 + $0x1], 1 }
 0x1a6   :  { %864 = vsyncpa [#allocation7], 1 }
 0x1a7   :  { %866 = vsyncpa [#allocation7 + $0x1], 1 }

</bundles_post_ra>
